<compile_context>
chip_gen: v7x
topology: tpu7x:2x2x1
jax: 0.10.0
libtpu: 0.0.40
codegen_flags: <defaults>
</compile_context>

<pallas_src>
import functools
import math

import jax
import jax.numpy as jnp
from jax.experimental import pallas as pl
from jax.experimental.pallas import tpu as pltpu


def _round_up(x, m):
    return ((x + m - 1) // m) * m


def _net_actor_kernel(x_ref, w1_ref, b1_ref, w2_ref, b2_ref, w34_ref, b34_ref,
                      o_ref, *, head):
    """One batch tile of the MLP. All dots accumulate in f32; epilogue in f32."""
    # Cast streamed obs to the (possibly bf16) MXU compute dtype inside the kernel.
    x = x_ref[...].astype(w1_ref.dtype)

    # layer1 + ReLU
    h1 = jnp.dot(x, w1_ref[...], preferred_element_type=jnp.float32) + b1_ref[...]
    h1 = jnp.maximum(h1, 0.0)

    # layer2 + ReLU
    h2 = jnp.dot(h1.astype(w2_ref.dtype), w2_ref[...],
                 preferred_element_type=jnp.float32) + b2_ref[...]
    h2 = jnp.maximum(h2, 0.0)

    # Fused heads: one matmul against [W3 | W4], then per-lane activation.
    z = jnp.dot(h2.astype(w34_ref.dtype), w34_ref[...],
                preferred_element_type=jnp.float32) + b34_ref[...]
    lane = jax.lax.broadcasted_iota(jnp.int32, z.shape, dimension=1)
    is_sig = lane < head
    # Single transcendental pass: sigmoid(x) = 0.5 * (1 + tanh(x/2)).
    t = jnp.tanh(jnp.where(is_sig, 0.5 * z, z))
    o_ref[...] = jnp.where(is_sig, 0.5 * t + 0.5, t)


def prepare_params(params, compute_dtype=jnp.float32):
    """One-time (per compute dtype) prep: fuse the two heads, cast weights.

    Hoisted out of the per-call path so the forward does no wrapper-side
    concat / pad / cast work.  Biases stay f32 (v5e-friendly epilogue).
    """
    w34 = jnp.concatenate([params["w3"], params["w4"]], axis=1)
    b34 = jnp.concatenate([params["b3"], params["b4"]], axis=1)
    return dict(
        w1=params["w1"].astype(compute_dtype),
        b1=params["b1"].astype(jnp.float32),
        w2=params["w2"].astype(compute_dtype),
        b2=params["b2"].astype(jnp.float32),
        w34=w34.astype(compute_dtype),
        b34=b34.astype(jnp.float32),
    )


def net_actor_forward(obs, prepared, *, tb=4096, min_tiles=2):
    """obs: (B, in_dim).  Returns (B, 2*(out_dim-1)) float32."""
    w1, b1 = prepared["w1"], prepared["b1"]
    w2, b2 = prepared["w2"], prepared["b2"]
    w34, b34 = prepared["w34"], prepared["b34"]

    B, in_dim = obs.shape
    h1_dim = w1.shape[1]
    h2_dim = w2.shape[1]
    out_width = w34.shape[1]          # 2 * (out_dim - 1)
    head = out_width // 2

    # Balanced batch tiles: at least `min_tiles` grid steps when the batch allows
    # (keeps v7x's 2nd TensorCore busy), rows per tile a multiple of 8.
    n_tiles = max(pl.cdiv(B, tb), min(min_tiles, pl.cdiv(B, 8)))
    tb_eff = _round_up(pl.cdiv(B, n_tiles), 8)
    grid = (pl.cdiv(B, tb_eff),)      # ragged last block handled by Pallas

    def resident(a):
        # Same block every grid step -> weights/biases stay resident in VMEM.
        return pl.BlockSpec(a.shape, lambda i: (0,) * a.ndim)

    in_specs = [
        pl.BlockSpec((tb_eff, in_dim), lambda i: (i, 0)),   # obs: tiled over batch
        resident(w1), resident(b1),
        resident(w2), resident(b2),
        resident(w34), resident(b34),
    ]
    # Lane width = out_width (== full array last dim), no 128-lane padding:
    # masked stores, but ~8x fewer output HBM bytes.
    out_specs = pl.BlockSpec((tb_eff, out_width), lambda i: (i, 0))
    out_shape = jax.ShapeDtypeStruct((B, out_width), jnp.float32)

    param_bytes = sum(int(a.size) * a.dtype.itemsize
                      for a in (w1, b1, w2, b2, w34, b34))
    cost = pl.CostEstimate(
        flops=2 * B * (in_dim * h1_dim + h1_dim * h2_dim + h2_dim * out_width),
        transcendentals=B * out_width,
        bytes_accessed=B * in_dim * obs.dtype.itemsize
                       + B * out_width * 4 + param_bytes,
    )

    kernel = functools.partial(_net_actor_kernel, head=head)
    return pl.pallas_call(
        kernel,
        grid=grid,
        in_specs=in_specs,
        out_specs=out_specs,
        out_shape=out_shape,
        cost_estimate=cost,
        compiler_params=pltpu.CompilerParams(
            dimension_semantics=("parallel",)),
    )(obs, w1, b1, w2, b2, w34, b34)


def init_params(key, in_dim, out_dim):
    """Deterministic PyTorch-style Linear init: U(-1/sqrt(fan_in), 1/sqrt(fan_in))."""
    def linear(k, fan_in, fan_out):
        kw, kb = jax.random.split(k)
        bound = 1.0 / math.sqrt(fan_in)
        w = jax.random.uniform(kw, (fan_in, fan_out), jnp.float32, -bound, bound)
        b = jax.random.uniform(kb, (1, fan_out), jnp.float32, -bound, bound)
        return w, b

    k1, k2, k3, k4 = jax.random.split(key, 4)
    w1, b1 = linear(k1, in_dim, 64)
    w2, b2 = linear(k2, 64, 64)
    w3, b3 = linear(k3, 64, out_dim - 1)
    w4, b4 = linear(k4, 64, out_dim - 1)
    return dict(w1=w1, b1=b1, w2=w2, b2=b2, w3=w3, b3=b3, w4=w4, b4=b4)


def _reference_forward(obs, p):
    h1 = jnp.maximum(obs @ p["w1"] + p["b1"], 0.0)
    h2 = jnp.maximum(h1 @ p["w2"] + p["b2"], 0.0)
    o1 = jax.nn.sigmoid(h2 @ p["w3"] + p["b3"])
    o2 = jnp.tanh(h2 @ p["w4"] + p["b4"])
    return jnp.concatenate([o1, o2], axis=-1)


if __name__ == "__main__":
    in_dim, out_dim = 32, 9                 # output width = 2*(out_dim-1) = 16

    key = jax.random.PRNGKey(0)
    k_obs, k_obs2, k_params = jax.random.split(key, 3)
    params = init_params(k_params, in_dim, out_dim)

    prepared_f32 = prepare_params(params, jnp.float32)
    prepared_bf16 = prepare_params(params, jnp.bfloat16)

    fwd = jax.jit(net_actor_forward)        # jit so any consumer-side ops fuse

    # Small batch: single grid step, exact tile.
    obs = jax.random.normal(k_obs, (8, in_dim), jnp.float32)
    out = jax.block_until_ready(fwd(obs, prepared_f32))
    ref = _reference_forward(obs, params)
    assert out.shape == (8, 2 * (out_dim - 1))
    assert jnp.allclose(out, ref, atol=1e-5, rtol=1e-5), "f32 small-batch mismatch"

    # Non-divisible batch: balanced tiles (2 x 264 rows), ragged last block.
    obs2 = jax.random.normal(k_obs2, (520, in_dim), jnp.float32)
    out2 = jax.block_until_ready(fwd(obs2, prepared_f32))
    ref2 = _reference_forward(obs2, params)
    assert out2.shape == (520, 2 * (out_dim - 1))
    assert jnp.allclose(out2, ref2, atol=1e-5, rtol=1e-5), "f32 tiled-batch mismatch"

    # bf16 MXU operands (memory-roofline path); obs streamed f32, cast in-kernel,
    # f32 accumulation and f32 epilogue.
    out_bf16 = jax.block_until_ready(fwd(obs2, prepared_bf16))
    assert jnp.allclose(out_bf16, ref2, atol=5e-2, rtol=5e-2), "bf16 path mismatch"

    print("KERNEL_OK")
</pallas_src>

<mosaic_0001>
module attributes {stable_mosaic.version = 11 : i64} {
  func.func @_net_actor_kernel(%arg0: i32, %arg1: memref<8x32xf32, #tpu.memory_space<vmem>>, %arg2: memref<32x64xf32, #tpu.memory_space<vmem>>, %arg3: memref<1x64xf32, #tpu.memory_space<vmem>>, %arg4: memref<64x64xf32, #tpu.memory_space<vmem>>, %arg5: memref<1x64xf32, #tpu.memory_space<vmem>>, %arg6: memref<64x16xf32, #tpu.memory_space<vmem>>, %arg7: memref<1x16xf32, #tpu.memory_space<vmem>>, %arg8: memref<8x16xf32, #tpu.memory_space<vmem>>) attributes {dimension_semantics = [#tpu.dimension_semantics<parallel>], iteration_bounds = array<i64: 1>, scalar_prefetch = 0 : i64, scratch_operands = 0 : i64, tpu.core_type = #tpu.core_type<tc>, window_params = [{transform_indices = @transform_0, window_bounds = array<i64: 8, 32>}, {pipeline_mode = #tpu.pipeline_mode<synchronous>, transform_indices = @transform_1, window_bounds = array<i64: 32, 64>}, {pipeline_mode = #tpu.pipeline_mode<synchronous>, transform_indices = @transform_2, window_bounds = array<i64: 1, 64>}, {pipeline_mode = #tpu.pipeline_mode<synchronous>, transform_indices = @transform_3, window_bounds = array<i64: 64, 64>}, {pipeline_mode = #tpu.pipeline_mode<synchronous>, transform_indices = @transform_4, window_bounds = array<i64: 1, 64>}, {pipeline_mode = #tpu.pipeline_mode<synchronous>, transform_indices = @transform_5, window_bounds = array<i64: 64, 16>}, {pipeline_mode = #tpu.pipeline_mode<synchronous>, transform_indices = @transform_6, window_bounds = array<i64: 1, 16>}, {transform_indices = @transform_7, window_bounds = array<i64: 8, 16>}]} {
    %c0 = arith.constant 0 : index
    %c0_0 = arith.constant 0 : index
    %0 = vector.load %arg1[%c0, %c0_0] : memref<8x32xf32, #tpu.memory_space<vmem>>, vector<8x32xf32>
    %c0_1 = arith.constant 0 : index
    %c0_2 = arith.constant 0 : index
    %1 = vector.load %arg2[%c0_1, %c0_2] : memref<32x64xf32, #tpu.memory_space<vmem>>, vector<32x64xf32>
    %cst = arith.constant dense<0.000000e+00> : vector<8x64xf32>
    %2 = tpu.matmul %0, %1, %cst {dimension_numbers = #tpu.dot_dimension_numbers<[1], [0], [0], [1], [0, 0, 1, 1], [], []>} : vector<8x32xf32>, vector<32x64xf32>, vector<8x64xf32> -> vector<8x64xf32>
    %c0_3 = arith.constant 0 : index
    %c0_4 = arith.constant 0 : index
    %3 = vector.load %arg3[%c0_3, %c0_4] : memref<1x64xf32, #tpu.memory_space<vmem>>, vector<1x64xf32>
    %4 = vector.broadcast %3 : vector<1x64xf32> to vector<8x64xf32>
    %5 = arith.addf %2, %4 : vector<8x64xf32>
    %cst_5 = arith.constant 0.000000e+00 : f32
    %6 = vector.broadcast %cst_5 : f32 to vector<8x64xf32>
    %7 = arith.maximumf %5, %6 : vector<8x64xf32>
    %c0_6 = arith.constant 0 : index
    %c0_7 = arith.constant 0 : index
    %8 = vector.load %arg4[%c0_6, %c0_7] : memref<64x64xf32, #tpu.memory_space<vmem>>, vector<64x64xf32>
    %cst_8 = arith.constant dense<0.000000e+00> : vector<8x64xf32>
    %9 = tpu.matmul %7, %8, %cst_8 {dimension_numbers = #tpu.dot_dimension_numbers<[1], [0], [0], [1], [0, 0, 1, 1], [], []>} : vector<8x64xf32>, vector<64x64xf32>, vector<8x64xf32> -> vector<8x64xf32>
    %c0_9 = arith.constant 0 : index
    %c0_10 = arith.constant 0 : index
    %10 = vector.load %arg5[%c0_9, %c0_10] : memref<1x64xf32, #tpu.memory_space<vmem>>, vector<1x64xf32>
    %11 = vector.broadcast %10 : vector<1x64xf32> to vector<8x64xf32>
    %12 = arith.addf %9, %11 : vector<8x64xf32>
    %cst_11 = arith.constant 0.000000e+00 : f32
    %13 = vector.broadcast %cst_11 : f32 to vector<8x64xf32>
    %14 = arith.maximumf %12, %13 : vector<8x64xf32>
    %c0_12 = arith.constant 0 : index
    %c0_13 = arith.constant 0 : index
    %15 = vector.load %arg6[%c0_12, %c0_13] : memref<64x16xf32, #tpu.memory_space<vmem>>, vector<64x16xf32>
    %cst_14 = arith.constant dense<0.000000e+00> : vector<8x16xf32>
    %16 = tpu.matmul %14, %15, %cst_14 {dimension_numbers = #tpu.dot_dimension_numbers<[1], [0], [0], [1], [0, 0, 1, 1], [], []>} : vector<8x64xf32>, vector<64x16xf32>, vector<8x16xf32> -> vector<8x16xf32>
    %c0_15 = arith.constant 0 : index
    %c0_16 = arith.constant 0 : index
    %17 = vector.load %arg7[%c0_15, %c0_16] : memref<1x16xf32, #tpu.memory_space<vmem>>, vector<1x16xf32>
    %18 = vector.broadcast %17 : vector<1x16xf32> to vector<8x16xf32>
    %19 = arith.addf %16, %18 : vector<8x16xf32>
    %20 = tpu.iota {dimensions = array<i32: 1>} : vector<8x16xi32>
    %c8_i32 = arith.constant 8 : i32
    %21 = vector.broadcast %c8_i32 : i32 to vector<8x16xi32>
    %22 = arith.cmpi slt, %20, %21 : vector<8x16xi32>
    %cst_17 = arith.constant 5.000000e-01 : f32
    %23 = vector.broadcast %cst_17 : f32 to vector<8x16xf32>
    %24 = arith.mulf %23, %19 : vector<8x16xf32>
    %25 = arith.select %22, %24, %19 : vector<8x16xi1>, vector<8x16xf32>
    %26 = math.tanh %25 : vector<8x16xf32>
    %cst_18 = arith.constant 5.000000e-01 : f32
    %27 = vector.broadcast %cst_18 : f32 to vector<8x16xf32>
    %28 = arith.mulf %27, %26 : vector<8x16xf32>
    %cst_19 = arith.constant 5.000000e-01 : f32
    %29 = vector.broadcast %cst_19 : f32 to vector<8x16xf32>
    %30 = arith.addf %28, %29 : vector<8x16xf32>
    %31 = arith.select %22, %30, %26 : vector<8x16xi1>, vector<8x16xf32>
    %c0_20 = arith.constant 0 : index
    %c0_21 = arith.constant 0 : index
    %32 = vector.load %arg8[%c0_20, %c0_21] : memref<8x16xf32, #tpu.memory_space<vmem>>, vector<8x16xf32>
    tpu.vector_store %arg8[%c0_20, %c0_21], %31 {strides = array<i32>} : memref<8x16xf32, #tpu.memory_space<vmem>>, vector<8x16xf32>,
    return
  }
  func.func @transform_0(%arg0: i32) -> (i32, i32) {
    %c0_i32 = arith.constant 0 : i32
    %c0_i32_0 = arith.constant 0 : i32
    return %arg0, %c0_i32 : i32, i32
  }
  func.func @transform_1(%arg0: i32) -> (i32, i32) {
    %c0_i32 = arith.constant 0 : i32
    %c0_i32_0 = arith.constant 0 : i32
    %c0_i32_1 = arith.constant 0 : i32
    return %c0_i32, %c0_i32_0 : i32, i32
  }
  func.func @transform_2(%arg0: i32) -> (i32, i32) {
    %c0_i32 = arith.constant 0 : i32
    %c0_i32_0 = arith.constant 0 : i32
    %c0_i32_1 = arith.constant 0 : i32
    return %c0_i32, %c0_i32_0 : i32, i32
  }
  func.func @transform_3(%arg0: i32) -> (i32, i32) {
    %c0_i32 = arith.constant 0 : i32
    %c0_i32_0 = arith.constant 0 : i32
    %c0_i32_1 = arith.constant 0 : i32
    return %c0_i32, %c0_i32_0 : i32, i32
  }
  func.func @transform_4(%arg0: i32) -> (i32, i32) {
    %c0_i32 = arith.constant 0 : i32
    %c0_i32_0 = arith.constant 0 : i32
    %c0_i32_1 = arith.constant 0 : i32
    return %c0_i32, %c0_i32_0 : i32, i32
  }
  func.func @transform_5(%arg0: i32) -> (i32, i32) {
    %c0_i32 = arith.constant 0 : i32
    %c0_i32_0 = arith.constant 0 : i32
    %c0_i32_1 = arith.constant 0 : i32
    return %c0_i32, %c0_i32_0 : i32, i32
  }
  func.func @transform_6(%arg0: i32) -> (i32, i32) {
    %c0_i32 = arith.constant 0 : i32
    %c0_i32_0 = arith.constant 0 : i32
    %c0_i32_1 = arith.constant 0 : i32
    return %c0_i32, %c0_i32_0 : i32, i32
  }
  func.func @transform_7(%arg0: i32) -> (i32, i32) {
    %c0_i32 = arith.constant 0 : i32
    %c0_i32_0 = arith.constant 0 : i32
    return %arg0, %c0_i32 : i32, i32
  }
}

</mosaic_0001>

<bundles_post_ra>
// kernel: net_actor_forward.1
= control target key start
LH: loop header
LB: loop body
LE: loop exit
PB: predicated region body
PF: predicated region fallthrough
CT: control target
= control target key end

     0   :  { %12 = vsyncpa [#allocation3], 0  ;;  %s682_s0 = inlined_call_operand.hbm [shape: f32[8,32], index: 0, kind: input, shape index: {}]   ;;  %s683_s1 = inlined_call_operand.vmem [shape: f32[32,64], index: 1, kind: input, shape index: {}]   ;;  %s684_s2 = inlined_call_operand.vmem [shape: f32[1,64], index: 2, kind: input, shape index: {}]   ;;  %s685_s3 = inlined_call_operand.vmem [shape: f32[64,64], index: 3, kind: input, shape index: {}]   ;;  %s686_s4 = inlined_call_operand.vmem [shape: f32[1,64], index: 4, kind: input, shape index: {}]   ;;  %s687_s5 = inlined_call_operand.vmem [shape: f32[64,16], index: 5, kind: input, shape index: {}]   ;;  %s688_s6 = inlined_call_operand.hbm [shape: f32[1,16], index: 6, kind: input, shape index: {}]   ;;  %s689_s7 = inlined_call_operand.hbm [shape: f32[8,16], index: 7, kind: output, shape index: {}]  }
   0x1   :  { %13 = vsyncpa [#allocation6], 0 }
   0x2   :  { %14 = vsyncpa [#allocation4], 0  ;;  %s531_s24 = smov [#allocation2]   ;;  %s532_s26 = smov [#allocation5]  }
   0x3   :  { %s21_s25 = sshll.u32 %s531_s24, 4  ;;  %s41_s27 = sshll.u32 %s532_s26, 4  ;;  %s22_s25 = int_to_ptr.vmem [resolvable:$true] %s21_s25  ;;  %s42_s27 = int_to_ptr.vmem [resolvable:$true] %s41_s27 }
   0x4   :  { %s459_s30 = scalar_lea.hbm %s682_s0, 128 }
   0x5   :  { %p460_p0 = scmp.ne.s32.totalorder %s682_s0, %s459_s30  ;;  %p463_p1 = scmp.lt.u32.totalorder %s459_s30, %s682_s0 }
   0x7   :  { %p465_p2 = pnand %p463_p1, %p460_p0 }
   0x9   :  { %468 = shalt.err (!%p465_p2)
}
   0xa   :  { %s469_s12 = scalar_lea.vmem %s22_s25, 128  ;;  %p474_p4 = scmp.lt.s32.totalorder %s22_s25, %s22_s25 }
   0xb   :  { %p470_p3 = scmp.ne.s32.totalorder %s22_s25, %s469_s12  ;;  %p475_p5 = scmp.lt.s32.totalorder %s469_s12, %s469_s12 }
   0xd   :  { %p476_p6 = por %p475_p5, %p474_p4 }
   0xf   :  { %p477_p7 = pnand %p476_p6, %p470_p3 }
  0x11   :  { %480 = shalt.err (!%p477_p7)
}
  0x12   :  { %24 = dma.hbm_to_vmem [thread:$0]  %s682_s0, 128, %s22_s25, [#allocation3]  }
  0x13   :  { %s481_s17 = scalar_lea.hbm %s688_s6, 16 }
  0x14   :  { %p482_p8 = scmp.ne.s32.totalorder %s688_s6, %s481_s17  ;;  %p485_p9 = scmp.lt.u32.totalorder %s481_s17, %s688_s6 }
  0x16   :  { %p487_p10 = pnand %p485_p9, %p482_p8 }
  0x18   :  { %490 = shalt.err (!%p487_p10)
}
  0x19   :  { %s491_s22 = scalar_lea.vmem %s42_s27, 16  ;;  %s495_s23 = scalar_lea.vmem %s42_s27, 32 }
  0x1a   :  { %p492_p11 = scmp.ne.s32.totalorder %s42_s27, %s491_s22  ;;  %p496_p12 = scmp.lt.s32.totalorder %s42_s27, %s42_s27 }
  0x1b   :  { %p497_p13 = scmp.lt.s32.totalorder %s495_s23, %s491_s22 }
  0x1d   :  { %p498_p0 = por %p497_p13, %p496_p12 }
  0x1f   :  { %p499_p1 = pnand %p498_p0, %p492_p11 }
  0x21   :  { %502 = shalt.err (!%p499_p1)
}
  0x22   :  { %44 = dma.hbm_to_vmem [thread:$0]  %s688_s6, 16, %s42_s27, [#allocation6]  }
  0x23   :  { %525 = dma.done.wait [#allocation3], 128  }
  0x24   :  { %526 = vsyncadd [#allocation3], 4294967168 }
  0x25   :  { %527 = dma.done.wait [#allocation6], 16  }
  0x26   :  { %528 = vsyncadd [#allocation6], 4294967280  ;;  %v533_v0 = vmov 0.0|0.0   ;;  %vm534_vm0 = vmmov 0   ;;  %v535_v1 = vmov 0.0   ;;  %v52_v2 = vld [vmem:[%s683_s1] sm:$0xff]  ;;  %v316_v43 = vlaneseq }
  0x27   :  { %421 = vmatprep.subr.bf16.mxu0 %v533_v0  ;;  %380 = vmatprep.mubr.msk.f32.mxu0 %vm534_vm0, %v535_v1  ;;  %v53_v3 = vld [vmem:[%s683_s1 + $0x8] sm:$0xff]  ;;  %v54_v4 = vld [vmem:[%s683_s1 + $0x10] sm:$0xff]  ;;  %v55_v6 = vld [vmem:[%s683_s1 + $0x18] sm:$0xff]  ;;  %vm63_vm1 = vcmask 261120   ;;  %vm153_vm2 = vcmask 523264   ;;  %vm325_vm4 = vcmask 130048  }
  0x28   :  { %427 = vmatprep.subr.bf16.mxu1 %v533_v0  ;;  %399 = vmatprep.mubr.msk.f32.mxu1 %vm534_vm0, %v535_v1  ;;  %v422_v5 = vpack.c.bf16 %v53_v3, %v52_v2  ;;  %v138_v7 = vld [vmem:[%s685_s3] sm:$0xff]  ;;  %v139_v8 = vld [vmem:[%s685_s3 + $0x8] sm:$0xff]  ;;  %v140_v9 = vld [vmem:[%s685_s3 + $0x10] sm:$0xff]  ;;  %v425_v11 = vpack.c.bf16 %v55_v6, %v54_v4  ;;  %v317_v45 = vand.u32 127, %v316_v43 }
  0x29   :  { %v141_v10 = vld [vmem:[%s685_s3 + $0x18] sm:$0xff]  ;;  %v428_v12 = vpack.c.bf16 %v139_v8, %v138_v7  ;;  %v142_v14 = vld [vmem:[%s685_s3 + $0x20] sm:$0xff]  ;;  %v143_v15 = vld [vmem:[%s685_s3 + $0x28] sm:$0xff] }
  0x2a   :  { %423 = vmatpush3.bf16.msra.mxu0 %v422_v5  ;;  %v431_v13 = vpack.c.bf16 %v141_v10, %v140_v9  ;;  %v51_v16 = vld [vmem:[#allocation2] sm:$0xff]  ;;  %v434_v17 = vpack.c.bf16 %v143_v15, %v142_v14  ;;  %v144_v18 = vld [vmem:[%s685_s3 + $0x30] sm:$0xff]  ;;  %v145_v19 = vld [vmem:[%s685_s3 + $0x38] sm:$0xff]  ;;  %vm318_vm3 = vcmp.lt.s32.totalorder %v317_v45, 8 }
  0x2b   :  { %424 = vmatprep.subr.bf16.mxu0 %v533_v0  ;;  %429 = vmatpush3.bf16.msra.mxu1 %v428_v12  ;;  %v437_v20 = vpack.c.bf16 %v145_v19, %v144_v18  ;;  %v228_v21 = vld [vmem:[%s687_s5] sm:$0xff]  ;;  %v229_v22 = vld [vmem:[%s687_s5 + $0x8] sm:$0xff]  ;;  %v230_v23 = vld [vmem:[%s687_s5 + $0x10] sm:$0xff] }
  0x2c   :  { %430 = vmatprep.subr.bf16.mxu1 %v533_v0  ;;  %v440_v24 = vpack.c.bf16 %v229_v22, %v228_v21  ;;  %v231_v25 = vld [vmem:[%s687_s5 + $0x18] sm:$0xff]  ;;  %v232_v27 = vld [vmem:[%s687_s5 + $0x20] sm:$0xff]  ;;  %v233_v28 = vld [vmem:[%s687_s5 + $0x28] sm:$0xff] }
  0x2d   :  { %v443_v26 = vpack.c.bf16 %v231_v25, %v230_v23  ;;  %v446_v29 = vpack.c.bf16 %v233_v28, %v232_v27  ;;  %v343_v30 = vld [vmem:[%s684_s2] ss:$0 sm:$0xff]  ;;  %v234_v35 = vld [vmem:[%s687_s5 + $0x30] sm:$0xff]  ;;  %v235_v36 = vld [vmem:[%s687_s5 + $0x38] sm:$0xff]  ;;  %s536_s2 = smov [#allocation7]  }
  0x2e   :  { %426 = vmatpush3.bf16.msra.mxu0 %v425_v11  ;;  %v449_v37 = vpack.c.bf16 %v235_v36, %v234_v35  ;;  %v345_v38 = vld [vmem:[%s686_s4] ss:$0 sm:$0xff]  ;;  %v347_v44 = vld [vmem:[#allocation5] ss:$0 sm:$0xff]  ;;  %s333_s5 = sshll.u32 %s536_s2, 4  ;;  %s334_s5 = int_to_ptr.vmem [resolvable:$true] %s333_s5 }
  0x2f   :  { %439 = vmatprep.subr.bf16.mxu0 %v533_v0  ;;  %432 = vmatpush3.bf16.msra.mxu1 %v431_v13  ;;  %s503_s4 = scalar_lea.vmem %s334_s5, 128  ;;  %p508_p3 = scmp.lt.s32.totalorder %s334_s5, %s334_s5 }
  0x30   :  { %433 = vmatprep.subr.bf16.mxu1 %v533_v0  ;;  %p504_p2 = scmp.ne.s32.totalorder %s334_s5, %s503_s4  ;;  %p509_p4 = scmp.lt.s32.totalorder %s503_s4, %s503_s4 }
  0x31   :  { %381 = vmatmul.mubr.msk.f32.vlgmr.msra.gmra.mrb[0].mxu0 %vm63_vm1, %v51_v16 }
  0x32   :  { %418 = vmatprep.mubr.msk.f32.mxu0 %vm534_vm0, %v535_v1  ;;  %441 = vmatpush3.bf16.msra.mxu0 %v440_v24  ;;  %p510_p5 = por %p509_p4, %p508_p3 }
  0x33   :  { %435 = vmatpush3.bf16.msra.mxu1 %v434_v17  ;;  %442 = vmatprep.subr.bf16.mxu0 %v533_v0 }
  0x34   :  { %436 = vmatprep.subr.bf16.mxu1 %v533_v0  ;;  %p511_p6 = pnand %p510_p5, %p504_p2 }
  0x36   :  { %444 = vmatpush3.bf16.msra.mxu0 %v443_v26 }
  0x37   :  { %438 = vmatpush3.bf16.msra.mxu1 %v437_v20  ;;  %445 = vmatprep.subr.bf16.mxu0 %v533_v0 }
  0x3a   :  { %447 = vmatpush3.bf16.msra.mxu0 %v446_v29 }
  0x3b   :  { %448 = vmatprep.subr.bf16.mxu0 %v533_v0 }
  0x3e   :  { %450 = vmatpush3.bf16.msra.mxu0 %v449_v37 }
 0x104   :  { %v133_v31 = vpop.f32.mrb[0].mxu0 }
 0x105   :  { %v134_v32 = vadd.f32 %v343_v30, %v133_v31  ;;  %v382_v33 = vpop.f32.mrb[1].mxu0 }
 0x107   :  { %v137_v34 = vmax.f32 %v134_v32, 0.0 }
 0x109   :  { %400 = vmatmul.mubr.msk.f32.vlgmr.msra.gmra.mrb[0].mxu1 %vm153_vm2, %v137_v34 }
 0x1dc   :  { %v223_v39 = vpop.f32.mrb[0].mxu1 }
 0x1dd   :  { %v224_v40 = vadd.f32 %v345_v38, %v223_v39  ;;  %v401_v41 = vpop.f32.mrb[1].mxu1 }
 0x1df   :  { %v227_v42 = vmax.f32 %v224_v40, 0.0 }
 0x1e1   :  { %419 = vmatmul.mubr.msk.f32.vlgmr.msra.gmra.mrb[2].mxu0 %vm153_vm2, %v227_v42 }
 0x2b4   :  { %v312_v46 = vpop.f32.mrb[2].mxu0 }
 0x2b5   :  { %v313_v47 = vadd.f32 %v347_v44, %v312_v46  ;;  %v420_v48 = vpop.f32.mrb[3].mxu0 }
 0x2b7   :  { %v319_v49 = vmul.f32 0.5, %v313_v47 }
 0x2b9   :  { %v320_v50 = vsel %vm318_vm3, %v319_v49, %v313_v47 }
 0x2ba   :  { %457 = vtanh.f32 %v320_v50 }
 0x2c4   :  { %v458_v51 = vpop.eup %457 }
 0x2c5   :  { %v322_v52 = vmul.f32 0.5, %v458_v51 }
 0x2c7   :  { %v323_v53 = vadd.f32 0.5, %v322_v52 }
 0x2c9   :  { %v324_v54 = vsel %vm318_vm3, %v323_v53, %v458_v51 }
 0x2ca   :  { %326 = vst.msk [vmem:[#allocation7] sm:$0xff] %vm325_vm4, %v324_v54 }
 0x2cb   :  { %514 = shalt.err (!%p511_p6)
}
 0x2cc   :  { %s515_s19 = scalar_lea.hbm %s689_s7, 128 }
 0x2cd   :  { %p516_p7 = scmp.ne.s32.totalorder %s689_s7, %s515_s19  ;;  %p519_p8 = scmp.lt.u32.totalorder %s515_s19, %s689_s7 }
 0x2cf   :  { %p521_p9 = pnand %p519_p8, %p516_p7 }
 0x2d1   :  { %524 = shalt.err (!%p521_p9)
}
 0x2d2   :  { %336 = dma.vmem_to_hbm [thread:$0]  %s334_s5, 128, %s689_s7, [#allocation4]  }
 0x2d3   :  { %529 = dma.done.wait [#allocation4], 128  }
 0x2d4   :  { %530 = vsyncadd [#allocation4], 4294967168 }
 0x2d5   :  { %340 = vsyncpa [#allocation3], 1 }
 0x2d6   :  { %341 = vsyncpa [#allocation6], 1 }
 0x2d7   :  { %342 = vsyncpa [#allocation4], 1 }

</bundles_post_ra>
